<compile_context>
chip_gen: v7x
topology: tpu7x:2x2x1
jax: 0.10.0
libtpu: 0.0.40
codegen_flags: <defaults>
</compile_context>

<pallas_src>
import functools
import numpy as np
import jax
import jax.numpy as jnp
from jax.experimental import pallas as pl
from jax.experimental.pallas import tpu as pltpu


# ---------------------------------------------------------------------------
# Pallas kernel 1: fused GCN stack  (tanh(A_norm @ (h @ W_l) + b_l) for all l)
# ---------------------------------------------------------------------------
def _gcn_stack_kernel(*refs, n_layers):
    a_ref, x_ref = refs[0], refs[1]
    o_ref = refs[2 + 2 * n_layers]
    a = a_ref[...]
    h = x_ref[...]
    off = 0
    for li in range(n_layers):
        w = refs[2 + 2 * li][...]
        b = refs[3 + 2 * li][...]
        xw = jnp.dot(h, w, preferred_element_type=jnp.float32)
        h = jnp.tanh(jnp.dot(a, xw, preferred_element_type=jnp.float32) + b)
        c = w.shape[1]
        o_ref[:, off:off + c] = h          # write this layer's slice of the concat
        off += c


def gcn_stack(a_norm, x0, convs):
    """One pallas_call for the whole conv stack; returns concat of all layer outputs."""
    N = x0.shape[0]
    total = sum(w.shape[1] for (w, _) in convs)
    args = [a_norm, x0]
    for (w, b) in convs:
        args += [w, b]                      # b already packed as [1, C] f32
    return pl.pallas_call(
        functools.partial(_gcn_stack_kernel, n_layers=len(convs)),
        out_shape=jax.ShapeDtypeStruct((N, total), jnp.float32),
        grid=(1,),
        in_specs=[pl.BlockSpec(a.shape, lambda i: (0, 0)) for a in args],
        out_specs=pl.BlockSpec((N, total), lambda i: (0, 0)),
    )(*args)


# ---------------------------------------------------------------------------
# Pallas kernel 2: fused head  conv1 -> relu -> maxpool(2,2) -> conv2 -> relu
#                              -> (NCL flatten folded into weights) -> lin1
#                              -> relu -> lin2
# Activations are carried position-major ( rows ordered (position, graph) ) so
# conv-tap shifts and per-position lin1 contractions are contiguous static
# slices of VMEM buffers.
# ---------------------------------------------------------------------------
def _head_kernel(xe_ref, xo_ref, w1_ref, b1_ref, w2_ref, b2_ref,
                 wl1_ref, bl1_ref, wl2_ref, bl2_ref, o_ref,
                 p_ref, h2_ref, *, B, L_out, taps, cin):
    # conv1 (Conv1d(1,16,D,stride=D) == position-wise linear) + relu, computed
    # separately on even / odd positions; MaxPool1d(2,2) is then an elementwise max.
    he = jnp.maximum(
        jnp.dot(xe_ref[...], w1_ref[...], preferred_element_type=jnp.float32) + b1_ref[...], 0.0)
    ho = jnp.maximum(
        jnp.dot(xo_ref[...], w1_ref[...], preferred_element_type=jnp.float32) + b1_ref[...], 0.0)
    p_ref[...] = jnp.maximum(he, ho)                       # [k2*B, 16], rows = (pos, graph)

    # conv2 (Conv1d(16,32,5,1)) as a sum of `taps` shifted matmuls, then relu.
    c2 = h2_ref.shape[1]
    acc2 = jnp.zeros((L_out * B, c2), jnp.float32)
    for t in range(taps):
        acc2 = acc2 + jnp.dot(p_ref[pl.ds(t * B, L_out * B), :],
                              w2_ref[pl.ds(t * cin, cin), :],
                              preferred_element_type=jnp.float32)
    h2_ref[...] = jnp.maximum(acc2 + b2_ref[...], 0.0)     # [L_out*B, 32], rows = (pos, graph)

    # lin1 + relu over the PyTorch-NCL-flattened conv2 output.  The flatten is
    # folded into wl1's row layout (rows = (position, channel)), so the
    # contraction is a sum of per-position [B,32]@[32,128] matmuls.
    acc1 = jnp.zeros((B, wl1_ref.shape[1]), jnp.float32)
    for t in range(L_out):
        acc1 = acc1 + jnp.dot(h2_ref[pl.ds(t * B, B), :],
                              wl1_ref[pl.ds(t * c2, c2), :],
                              preferred_element_type=jnp.float32)
    y1 = jnp.maximum(acc1 + bl1_ref[...], 0.0)             # [B, 128], never leaves VMEM

    # TODO(synk): F.dropout(p=0.5) after lin1 is omitted — kernel assumes eval mode.

    # lin2: single [B,128] @ [128,1] — the only 1-lane masked store in the model.
    o_ref[...] = jnp.dot(y1, wl2_ref[...], preferred_element_type=jnp.float32) + bl2_ref[...]


def head_forward(packed, x_pool, k):
    B = x_pool.shape[0]
    D = packed["w1"].shape[0]
    cin = packed["w1"].shape[1]                     # 16
    taps = packed["w2"].shape[0] // cin             # 5
    k2 = k // 2                                     # MaxPool1d(2,2) floor behaviour (odd k ok)
    L_out = k2 - taps + 1

    # Cheap XLA-side plumbing on the *input* only: split even/odd positions and
    # reorder rows position-major (pos, graph) so everything in-kernel is a
    # contiguous static slice.
    xk = x_pool.reshape(B, k, D)
    xe = jnp.transpose(xk[:, 0:2 * k2:2, :], (1, 0, 2)).reshape(k2 * B, D)
    xo = jnp.transpose(xk[:, 1:2 * k2:2, :], (1, 0, 2)).reshape(k2 * B, D)

    args = (xe, xo, packed["w1"], packed["b1"], packed["w2"], packed["b2"],
            packed["wl1"], packed["bl1"], packed["wl2"], packed["bl2"])
    kernel = functools.partial(_head_kernel, B=B, L_out=L_out, taps=taps, cin=cin)
    return pl.pallas_call(
        kernel,
        out_shape=jax.ShapeDtypeStruct((B, 1), jnp.float32),
        grid=(1,),
        in_specs=[pl.BlockSpec(a.shape, lambda i: (0, 0)) for a in args],
        out_specs=pl.BlockSpec((B, 1), lambda i: (0, 0)),
        scratch_shapes=[pltpu.VMEM((k2 * B, cin), jnp.float32),      # pooled conv1 output
                        pltpu.VMEM((L_out * B, 32), jnp.float32)],   # conv2 output
    )(*args)


# ---------------------------------------------------------------------------
# Glue: global_random_pool (scatter to dense batch, per-graph random perm)
# ---------------------------------------------------------------------------
def global_random_pool_jax(x, batch_np, counts, k, key):
    B = len(counts)
    n_max = int(max(counts))
    D = x.shape[1]
    pos = np.concatenate([np.arange(c) for c in counts]).astype(np.int32)
    dense_x = jnp.zeros((B, n_max, D), dtype=x.dtype)
    dense_x = dense_x.at[batch_np, pos].set(x)
    mask = jnp.zeros((B, n_max), dtype=bool).at[batch_np, pos].set(True)   # explicit padding mask
    perms = jnp.stack([jax.random.permutation(sk, n_max)
                       for sk in jax.random.split(key, B)])
    dense_x = jnp.take_along_axis(dense_x, perms[:, :, None], axis=1)
    mask = jnp.take_along_axis(mask, perms, axis=1)
    if n_max >= k:
        dense_x, mask = dense_x[:, :k], mask[:, :k]
    else:
        dense_x = jnp.concatenate(
            [dense_x, jnp.zeros((B, k - n_max, D), dtype=x.dtype)], axis=1)
        mask = jnp.concatenate([mask, jnp.zeros((B, k - n_max), dtype=bool)], axis=1)
    dense_x = jnp.where(mask[:, :, None], dense_x, 0.0)    # padding -> 0 (same as torch fill trick)
    return dense_x.reshape(B, k * D)


# ---------------------------------------------------------------------------
# Parameters (deterministic synthetic init, same shapes as the torch module)
# ---------------------------------------------------------------------------
def init_params(key, hidden, num_layers, max_z, k):
    keys = jax.random.split(key, 16)
    params = {}
    params["z_emb"] = 0.1 * jax.random.normal(keys[0], (max_z, hidden), jnp.float32)
    conv_dims = ([(hidden, hidden)] + [(hidden, hidden)] * (num_layers - 1)
                 + [(hidden, 1)])
    convs = []
    for idx, (ci, co) in enumerate(conv_dims):
        kw, kb = jax.random.split(keys[1 + idx])
        W = jax.random.normal(kw, (ci, co), jnp.float32) / jnp.sqrt(ci)
        b = 0.01 * jax.random.normal(kb, (co,), jnp.float32)
        convs.append((W, b))
    params["convs"] = convs
    D = hidden * num_layers + 1
    params["conv1_w"] = jax.random.normal(keys[8], (16, 1, D), jnp.float32) / jnp.sqrt(D)
    params["conv1_b"] = 0.01 * jax.random.normal(keys[9], (16,), jnp.float32)
    params["conv2_w"] = jax.random.normal(keys[10], (32, 16, 5), jnp.float32) / jnp.sqrt(80.0)
    params["conv2_b"] = 0.01 * jax.random.normal(keys[11], (32,), jnp.float32)
    dense_dim = int((k - 2) / 2 + 1)
    dense_dim = (dense_dim - 5 + 1) * 32
    params["lin1_w"] = jax.random.normal(keys[12], (128, dense_dim), jnp.float32) / jnp.sqrt(dense_dim)
    params["lin1_b"] = 0.01 * jax.random.normal(keys[13], (128,), jnp.float32)
    params["lin2_w"] = jax.random.normal(keys[14], (1, 128), jnp.float32) / jnp.sqrt(128.0)
    params["lin2_b"] = 0.01 * jax.random.normal(keys[15], (1,), jnp.float32)
    return params


def pack_params(params, k):
    """One-time repacking of the torch-shaped weights into the kernel layouts (f32)."""
    n_out1, _, D = params["conv1_w"].shape          # (16, 1, total_latent)
    cout2, cin2, taps = params["conv2_w"].shape     # (32, 16, 5)
    k2 = k // 2
    L_out = k2 - taps + 1
    packed = {
        "z_emb": params["z_emb"],
        # GCN layers: W [Cin, Cout], bias as [1, Cout]
        "convs": [(w, b.reshape(1, -1)) for (w, b) in params["convs"]],
        # conv1 as a position-wise linear: [D, 16]
        "w1": params["conv1_w"].reshape(n_out1, D).T,
        "b1": params["conv1_b"].reshape(1, -1),
        # conv2 weights stacked per tap: rows (tap, in_ch) -> [5*16, 32]
        "w2": jnp.transpose(params["conv2_w"], (2, 1, 0)).reshape(taps * cin2, cout2),
        "b2": params["conv2_b"].reshape(1, -1),
        # lin1 with the torch NCL-flatten folded in: rows (position, channel) -> [L_out*32, 128]
        "wl1": jnp.transpose(params["lin1_w"].reshape(128, cout2, L_out), (2, 1, 0)
                             ).reshape(L_out * cout2, 128),
        "bl1": params["lin1_b"].reshape(1, -1),
        "wl2": params["lin2_w"].T,                   # [128, 1]
        "bl2": params["lin2_b"].reshape(1, -1),
    }
    return packed


# ---------------------------------------------------------------------------
# Forward pass (mirrors DGCNN.forward with use_feature=False, random_pool=True)
# ---------------------------------------------------------------------------
def dgcnn_forward(packed, z, edge_index, batch_np, counts, k, pool_key):
    N = z.shape[0]

    # z embedding lookup (gather; glue)
    x = packed["z_emb"][z]                                   # [N, hidden]

    # normalized dense adjacency: D^-1/2 (A + I) D^-1/2  (GCNConv normalization)
    A = jnp.zeros((N, N), jnp.float32)
    A = A.at[edge_index[1], edge_index[0]].set(1.0)
    A = A + jnp.eye(N, dtype=jnp.float32)
    deg = A.sum(axis=1)
    dinv = jnp.where(deg > 0, 1.0 / jnp.sqrt(deg), 0.0)
    A_norm = dinv[:, None] * A * dinv[None, :]

    # fused GCN stack + tanh + concat   (one Pallas call, A_norm DMA'd once)
    x = gcn_stack(A_norm, x, packed["convs"])                # [N, hidden*num_layers + 1]

    # global random pooling -> [B, k*D]   (permutation/gather; glue)
    x = global_random_pool_jax(x, batch_np, counts, k, pool_key)

    # fused head: conv1 -> relu -> maxpool -> conv2 -> relu -> lin1 -> relu -> lin2
    return head_forward(packed, x, k)                        # [B, 1]


# ---------------------------------------------------------------------------
if __name__ == "__main__":
    hidden_channels = 8
    num_layers = 2
    max_z = 10
    k = 30                      # DGCNN default: k=0.6 <= 1 and train_dataset is None -> k = 30
    counts = [12, 10]           # nodes per graph
    B = len(counts)
    N = sum(counts)

    key = jax.random.PRNGKey(0)
    kz, ke, kp, kpool = jax.random.split(key, 4)

    # node labels z in [0, max_z)
    z = jax.random.randint(kz, (N,), 0, max_z)

    # random intra-graph edges, symmetrized
    edges = []
    offset = 0
    ek = ke
    for c in counts:
        ek, sub = jax.random.split(ek)
        e = jax.random.randint(sub, (2, 2 * c), 0, c) + offset
        edges.append(e)
        offset += c
    edge_index = jnp.concatenate(edges, axis=1)
    edge_index = jnp.concatenate([edge_index, jnp.flip(edge_index, axis=0)], axis=1)

    batch_np = np.concatenate([np.full(c, i) for i, c in enumerate(counts)]).astype(np.int32)

    params = init_params(kp, hidden_channels, num_layers, max_z, k)
    packed = pack_params(params, k)
    out = dgcnn_forward(packed, z, edge_index, batch_np, counts, k, kpool)
    out = jax.block_until_ready(out)

    assert out.shape == (B, 1), out.shape
    assert bool(jnp.all(jnp.isfinite(out)))
    print("KERNEL_OK")
</pallas_src>

<mosaic_0001>
module attributes {stable_mosaic.version = 11 : i64} {
  func.func @_gcn_stack_kernel(%arg0: i32, %arg1: memref<22x22xf32, #tpu.memory_space<vmem>>, %arg2: memref<22x8xf32, #tpu.memory_space<vmem>>, %arg3: memref<8x8xf32, #tpu.memory_space<vmem>>, %arg4: memref<1x8xf32, #tpu.memory_space<vmem>>, %arg5: memref<8x8xf32, #tpu.memory_space<vmem>>, %arg6: memref<1x8xf32, #tpu.memory_space<vmem>>, %arg7: memref<8x1xf32, #tpu.memory_space<vmem>>, %arg8: memref<1x1xf32, #tpu.memory_space<vmem>>, %arg9: memref<22x17xf32, #tpu.memory_space<vmem>>) attributes {dimension_semantics = [#tpu.dimension_semantics<arbitrary>], iteration_bounds = array<i64: 1>, scalar_prefetch = 0 : i64, scratch_operands = 0 : i64, tpu.core_type = #tpu.core_type<tc>, window_params = [{pipeline_mode = #tpu.pipeline_mode<synchronous>, transform_indices = @transform_0, window_bounds = array<i64: 22, 22>}, {pipeline_mode = #tpu.pipeline_mode<synchronous>, transform_indices = @transform_1, window_bounds = array<i64: 22, 8>}, {pipeline_mode = #tpu.pipeline_mode<synchronous>, transform_indices = @transform_2, window_bounds = array<i64: 8, 8>}, {pipeline_mode = #tpu.pipeline_mode<synchronous>, transform_indices = @transform_3, window_bounds = array<i64: 1, 8>}, {pipeline_mode = #tpu.pipeline_mode<synchronous>, transform_indices = @transform_4, window_bounds = array<i64: 8, 8>}, {pipeline_mode = #tpu.pipeline_mode<synchronous>, transform_indices = @transform_5, window_bounds = array<i64: 1, 8>}, {pipeline_mode = #tpu.pipeline_mode<synchronous>, transform_indices = @transform_6, window_bounds = array<i64: 8, 1>}, {pipeline_mode = #tpu.pipeline_mode<synchronous>, transform_indices = @transform_7, window_bounds = array<i64: 1, 1>}, {pipeline_mode = #tpu.pipeline_mode<synchronous>, transform_indices = @transform_8, window_bounds = array<i64: 22, 17>}]} {
    %c0 = arith.constant 0 : index
    %c0_0 = arith.constant 0 : index
    %0 = vector.load %arg1[%c0, %c0_0] : memref<22x22xf32, #tpu.memory_space<vmem>>, vector<22x22xf32>
    %c0_1 = arith.constant 0 : index
    %c0_2 = arith.constant 0 : index
    %1 = vector.load %arg2[%c0_1, %c0_2] : memref<22x8xf32, #tpu.memory_space<vmem>>, vector<22x8xf32>
    %c0_3 = arith.constant 0 : index
    %c0_4 = arith.constant 0 : index
    %2 = vector.load %arg3[%c0_3, %c0_4] : memref<8x8xf32, #tpu.memory_space<vmem>>, vector<8x8xf32>
    %c0_5 = arith.constant 0 : index
    %c0_6 = arith.constant 0 : index
    %3 = vector.load %arg4[%c0_5, %c0_6] : memref<1x8xf32, #tpu.memory_space<vmem>>, vector<1x8xf32>
    %cst = arith.constant dense<0.000000e+00> : vector<22x8xf32>
    %4 = tpu.matmul %1, %2, %cst {dimension_numbers = #tpu.dot_dimension_numbers<[1], [0], [0], [1], [0, 0, 1, 1], [], []>} : vector<22x8xf32>, vector<8x8xf32>, vector<22x8xf32> -> vector<22x8xf32>
    %cst_7 = arith.constant dense<0.000000e+00> : vector<22x8xf32>
    %5 = tpu.matmul %0, %4, %cst_7 {dimension_numbers = #tpu.dot_dimension_numbers<[1], [0], [0], [1], [0, 0, 1, 1], [], []>} : vector<22x22xf32>, vector<22x8xf32>, vector<22x8xf32> -> vector<22x8xf32>
    %6 = vector.broadcast %3 : vector<1x8xf32> to vector<22x8xf32>
    %7 = arith.addf %5, %6 : vector<22x8xf32>
    %8 = math.tanh %7 : vector<22x8xf32>
    %c0_8 = arith.constant 0 : index
    %c0_9 = arith.constant 0 : index
    %9 = vector.load %arg9[%c0_8, %c0_9] : memref<22x17xf32, #tpu.memory_space<vmem>>, vector<22x8xf32>
    tpu.vector_store %arg9[%c0_8, %c0_9], %8 {strides = array<i32>} : memref<22x17xf32, #tpu.memory_space<vmem>>, vector<22x8xf32>,
    %c0_10 = arith.constant 0 : index
    %c0_11 = arith.constant 0 : index
    %10 = vector.load %arg5[%c0_10, %c0_11] : memref<8x8xf32, #tpu.memory_space<vmem>>, vector<8x8xf32>
    %c0_12 = arith.constant 0 : index
    %c0_13 = arith.constant 0 : index
    %11 = vector.load %arg6[%c0_12, %c0_13] : memref<1x8xf32, #tpu.memory_space<vmem>>, vector<1x8xf32>
    %cst_14 = arith.constant dense<0.000000e+00> : vector<22x8xf32>
    %12 = tpu.matmul %8, %10, %cst_14 {dimension_numbers = #tpu.dot_dimension_numbers<[1], [0], [0], [1], [0, 0, 1, 1], [], []>} : vector<22x8xf32>, vector<8x8xf32>, vector<22x8xf32> -> vector<22x8xf32>
    %cst_15 = arith.constant dense<0.000000e+00> : vector<22x8xf32>
    %13 = tpu.matmul %0, %12, %cst_15 {dimension_numbers = #tpu.dot_dimension_numbers<[1], [0], [0], [1], [0, 0, 1, 1], [], []>} : vector<22x22xf32>, vector<22x8xf32>, vector<22x8xf32> -> vector<22x8xf32>
    %14 = vector.broadcast %11 : vector<1x8xf32> to vector<22x8xf32>
    %15 = arith.addf %13, %14 : vector<22x8xf32>
    %16 = math.tanh %15 : vector<22x8xf32>
    %c0_16 = arith.constant 0 : index
    %c8 = arith.constant 8 : index
    %17 = vector.load %arg9[%c0_16, %c8] : memref<22x17xf32, #tpu.memory_space<vmem>>, vector<22x8xf32>
    tpu.vector_store %arg9[%c0_16, %c8], %16 {strides = array<i32>} : memref<22x17xf32, #tpu.memory_space<vmem>>, vector<22x8xf32>,
    %c0_17 = arith.constant 0 : index
    %c0_18 = arith.constant 0 : index
    %18 = vector.load %arg7[%c0_17, %c0_18] : memref<8x1xf32, #tpu.memory_space<vmem>>, vector<8x1xf32>
    %c0_19 = arith.constant 0 : index
    %c0_20 = arith.constant 0 : index
    %19 = vector.load %arg8[%c0_19, %c0_20] : memref<1x1xf32, #tpu.memory_space<vmem>>, vector<1x1xf32>
    %cst_21 = arith.constant dense<0.000000e+00> : vector<22x1xf32>
    %20 = tpu.matmul %16, %18, %cst_21 {dimension_numbers = #tpu.dot_dimension_numbers<[1], [0], [0], [1], [0, 0, 1, 1], [], []>} : vector<22x8xf32>, vector<8x1xf32>, vector<22x1xf32> -> vector<22x1xf32>
    %cst_22 = arith.constant dense<0.000000e+00> : vector<22x1xf32>
    %21 = tpu.matmul %0, %20, %cst_22 {dimension_numbers = #tpu.dot_dimension_numbers<[1], [0], [0], [1], [0, 0, 1, 1], [], []>} : vector<22x22xf32>, vector<22x1xf32>, vector<22x1xf32> -> vector<22x1xf32>
    %22 = vector.broadcast %19 : vector<1x1xf32> to vector<22x1xf32>
    %23 = arith.addf %21, %22 : vector<22x1xf32>
    %24 = math.tanh %23 : vector<22x1xf32>
    %c0_23 = arith.constant 0 : index
    %c16 = arith.constant 16 : index
    %25 = vector.load %arg9[%c0_23, %c16] : memref<22x17xf32, #tpu.memory_space<vmem>>, vector<22x1xf32>
    tpu.vector_store %arg9[%c0_23, %c16], %24 {strides = array<i32>} : memref<22x17xf32, #tpu.memory_space<vmem>>, vector<22x1xf32>,
    return
  }
  func.func @transform_0(%arg0: i32) -> (i32, i32) {
    %c0_i32 = arith.constant 0 : i32
    %c0_i32_0 = arith.constant 0 : i32
    %c0_i32_1 = arith.constant 0 : i32
    return %c0_i32, %c0_i32_0 : i32, i32
  }
  func.func @transform_1(%arg0: i32) -> (i32, i32) {
    %c0_i32 = arith.constant 0 : i32
    %c0_i32_0 = arith.constant 0 : i32
    %c0_i32_1 = arith.constant 0 : i32
    return %c0_i32, %c0_i32_0 : i32, i32
  }
  func.func @transform_2(%arg0: i32) -> (i32, i32) {
    %c0_i32 = arith.constant 0 : i32
    %c0_i32_0 = arith.constant 0 : i32
    %c0_i32_1 = arith.constant 0 : i32
    return %c0_i32, %c0_i32_0 : i32, i32
  }
  func.func @transform_3(%arg0: i32) -> (i32, i32) {
    %c0_i32 = arith.constant 0 : i32
    %c0_i32_0 = arith.constant 0 : i32
    %c0_i32_1 = arith.constant 0 : i32
    return %c0_i32, %c0_i32_0 : i32, i32
  }
  func.func @transform_4(%arg0: i32) -> (i32, i32) {
    %c0_i32 = arith.constant 0 : i32
    %c0_i32_0 = arith.constant 0 : i32
    %c0_i32_1 = arith.constant 0 : i32
    return %c0_i32, %c0_i32_0 : i32, i32
  }
  func.func @transform_5(%arg0: i32) -> (i32, i32) {
    %c0_i32 = arith.constant 0 : i32
    %c0_i32_0 = arith.constant 0 : i32
    %c0_i32_1 = arith.constant 0 : i32
    return %c0_i32, %c0_i32_0 : i32, i32
  }
  func.func @transform_6(%arg0: i32) -> (i32, i32) {
    %c0_i32 = arith.constant 0 : i32
    %c0_i32_0 = arith.constant 0 : i32
    %c0_i32_1 = arith.constant 0 : i32
    return %c0_i32, %c0_i32_0 : i32, i32
  }
  func.func @transform_7(%arg0: i32) -> (i32, i32) {
    %c0_i32 = arith.constant 0 : i32
    %c0_i32_0 = arith.constant 0 : i32
    %c0_i32_1 = arith.constant 0 : i32
    return %c0_i32, %c0_i32_0 : i32, i32
  }
  func.func @transform_8(%arg0: i32) -> (i32, i32) {
    %c0_i32 = arith.constant 0 : i32
    %c0_i32_0 = arith.constant 0 : i32
    %c0_i32_1 = arith.constant 0 : i32
    return %c0_i32, %c0_i32_0 : i32, i32
  }
}

</mosaic_0001>

<bundles_post_ra>
// kernel: tpu_custom_call.1
= control target key start
LH: loop header
LB: loop body
LE: loop exit
PB: predicated region body
PF: predicated region fallthrough
CT: control target
= control target key end

     0   :  { %s1027_s0 = inlined_call_operand.vmem [shape: f32[22,22], index: 0, kind: input, shape index: {}]   ;;  %s1028_s1 = inlined_call_operand.vmem [shape: f32[22,8], index: 1, kind: input, shape index: {}]   ;;  %s1029_s2 = inlined_call_operand.vmem [shape: f32[8,8], index: 2, kind: input, shape index: {}]   ;;  %s1030_s3 = inlined_call_operand.vmem [shape: f32[1,8], index: 3, kind: input, shape index: {}]   ;;  %s1031_s4 = inlined_call_operand.vmem [shape: f32[8,8], index: 4, kind: input, shape index: {}]   ;;  %s1032_s5 = inlined_call_operand.vmem [shape: f32[1,8], index: 5, kind: input, shape index: {}]   ;;  %s1033_s6 = inlined_call_operand.vmem [shape: f32[8,1], index: 6, kind: input, shape index: {}]   ;;  %s1034_s7 = inlined_call_operand.<no memory space> [shape: f32[1,1], index: 7, kind: input, shape index: {}]   ;;  %s1035_s8 = inlined_call_operand.hbm [shape: f32[22,17], index: 8, kind: output, shape index: {}]  }
   0x1   :  { %v13_v0 = vstv %s1034_s7 }
   0x2   :  { %14 = vst [vmem:[#allocation2] sm:$0x1] %v13_v0 }
   0x3   :  { %v38_v1 = vld [vmem:[%s1029_s2] sm:$0xff]  ;;  %vm40_vm0 = vcmask 64512   ;;  %v840_v3 = vmov 0.0   ;;  %vm841_vm1 = vmmov 0  }
   0x4   :  { %v35_v2 = vld [vmem:[%s1028_s1] sm:$0xff]  ;;  %704 = vmatprep.subr.mxu0 %v840_v3  ;;  %706 = vmatprep.mubr.msk.f32.mxu0 %vm841_vm1, %v840_v3 }
   0x5   :  { %15 = vsyncpa [#allocation4], 0  ;;  %705 = vmatpush3.msra.mxu0 %v38_v1  ;;  %721 = vmatprep.mubr.msk.f32.mxu1 %vm841_vm1, %v840_v3  ;;  %v36_v4 = vld [vmem:[%s1028_s1 + $0x8] sm:$0xff]  ;;  %v37_v5 = vld [vmem:[%s1028_s1 + $0x10] sm:$0x3f]  ;;  %v842_v6 = vmov 0.0|0.0  }
   0x6   :  { %707 = vmatmul.mubr.msk.f32.vlgmr.msra.gmra.mrb[0].mxu0 %vm40_vm0, %v35_v2  ;;  %730 = vmatprep.subr.mxu0 %v840_v3  ;;  %vm146_vm2 = vcmask 1045504   ;;  %v927_v14 = vld [vmem:[%s1027_s0] sm:$0xff]  ;;  %vm136_vm3 = vcmask 179200   ;;  %v938_v15 = vld [vmem:[%s1027_s0 + $0x8] sm:$0xff]  ;;  %v947_v16 = vld [vmem:[%s1027_s0 + $0x10] sm:$0x3f] }
   0x7   :  { %709 = vmatprep.mubr.msk.f32.mxu0 %vm841_vm1, %v840_v3  ;;  %782 = vmatprep.subr.bf16.mxu1 %v842_v6  ;;  %v237_v17 = vld [vmem:[%s1031_s4] sm:$0xff]  ;;  %vm235_vm4 = vcmask 62464   ;;  %s843_s23 = smov 8   ;;  %vm432_vm5 = vcmask 130112   ;;  %vm435_vm6 = vcmask 128064   ;;  %vm629_vm7 = vcmask 138368  }
   0x8   :  { %731 = vmatpush3.msra.mxu0 %v237_v17  ;;  %v653_v18 = vld [vmem:[%s1030_s3] ss:$0 sm:$0xff]  ;;  %vm632_vm8 = vcmask 136320  }
   0x9   :  { %756 = vmatprep.subr.mxu0 %v840_v3  ;;  %v437_v38 = vld [vmem:[%s1033_s6] sm:$0xff]  ;;  %s845_s6 = smov [#allocation3]  }
   0xa   :  { %710 = vmatmul.mubr.msk.f32.gmra.mrb[2].mxu0 %vm40_vm0, %v36_v4  ;;  %v661_v39 = vld [vmem:[%s1032_s5] ss:$0 sm:$0xff]  ;;  %s844_s5 = smov 16   ;;  %s639_s24 = sshll.u32 %s845_s6, 4  ;;  %s640_s24 = int_to_ptr.vmem [resolvable:$true] %s639_s24 }
   0xb   :  { %712 = vmatprep.mubr.msk.f32.mxu0 %vm841_vm1, %v840_v3  ;;  %v669_v62 = vld [vmem:[#allocation2] ss:$0 sm:$0xff]  ;;  %s816_s25 = scalar_lea.vmem %s640_s24, 384  ;;  %p821_p1 = scmp.lt.s32.totalorder %s640_s24, %s640_s24 }
   0xc   :  { %p817_p0 = scmp.ne.s32.totalorder %s640_s24, %s816_s25  ;;  %p822_p2 = scmp.lt.s32.totalorder %s816_s25, %s816_s25 }
   0xe   :  { %713 = vmatmul.mubr.msk.f32.gmra.mrb[4].mxu0 %vm40_vm0, %v37_v5  ;;  %p823_p3 = por %p822_p2, %p821_p1 }
   0xf   :  { %732 = vmatprep.mubr.msk.f32.mxu0 %vm841_vm1, %v840_v3 }
  0x10   :  { %p824_p4 = pnand %p823_p3, %p817_p0 }
  0xd9   :  { %v116_v7 = vpop.f32.mrb[0].mxu0 }
  0xda   :  { %v708_v8 = vpop.f32.mrb[1].mxu0 }
  0xdd   :  { %v121_v9 = vpop.f32.mrb[2].mxu0 }
  0xde   :  { %v783_v10 = vpack.c.bf16 %v121_v9, %v116_v7  ;;  %v711_v11 = vpop.f32.mrb[3].mxu0 }
  0xe0   :  { %784 = vmatpush3.bf16.msra.mxu1 %v783_v10 }
  0xe1   :  { %v126_v12 = vpop.f32.mrb[4].mxu0  ;;  %719 = vmatprep.subr.mxu1 %v840_v3 }
  0xe2   :  { %v714_v13 = vpop.f32.mrb[5].mxu0 }
  0xe4   :  { %720 = vmatpush3.msk.msra.mxu1 %vm146_vm2, %v126_v12 }
  0xe5   :  { %722 = vmatmul.mubr.msk.f32.vlgmr.msra.gmra.mrb[0].mxu1 %vm136_vm3, %v927_v14  ;;  %785 = vmatprep.subr.bf16.mxu1 %v842_v6 }
  0xe6   :  { %724 = vmatprep.mubr.msk.f32.mxu1 %vm841_vm1, %v840_v3 }
  0xe9   :  { %725 = vmatmul.mubr.msk.f32.gmra.mrb[2].mxu1 %vm136_vm3, %v938_v15 }
  0xea   :  { %727 = vmatprep.mubr.msk.f32.mxu1 %vm841_vm1, %v840_v3 }
  0xed   :  { %728 = vmatmul.mubr.msk.f32.gmra.mrb[4].mxu1 %vm136_vm3, %v947_v16 }
  0xee   :  { %747 = vmatprep.mubr.msk.f32.mxu1 %vm841_vm1, %v840_v3 }
 0x1b8   :  { %v216_v19 = vpop.f32.mrb[0].mxu1 }
 0x1b9   :  { %v217_v20 = vadd.f32 %v653_v18, %v216_v19  ;;  %v723_v21 = vpop.f32.mrb[1].mxu1 }
 0x1bb   :  { %798 = vtanh.f32 %v217_v20 }
 0x1bc   :  { %v221_v22 = vpop.f32.mrb[2].mxu1 }
 0x1bd   :  { %v222_v23 = vadd.f32 %v653_v18, %v221_v22  ;;  %v726_v24 = vpop.f32.mrb[3].mxu1 }
 0x1bf   :  { %800 = vtanh.f32 %v222_v23 }
 0x1c0   :  { %v226_v25 = vpop.f32.mrb[4].mxu1 }
 0x1c1   :  { %v227_v26 = vadd.f32 %v653_v18, %v226_v25  ;;  %v729_v27 = vpop.f32.mrb[5].mxu1 }
 0x1c3   :  { %802 = vtanh.f32 %v227_v26 }
 0x1c5   :  { %v799_v28 = vpop.eup %798 }
 0x1c6   :  { %233 = vst.msk [vmem:[#allocation3] sm:$0xff] %vm40_vm0, %v799_v28  ;;  %733 = vmatmul.mubr.msk.f32.vlgmr.msra.gmra.mrb[6].mxu0 %vm40_vm0, %v799_v28 }
 0x1c7   :  { %735 = vmatprep.mubr.msk.f32.mxu0 %vm841_vm1, %v840_v3  ;;  %757 = vmatpush3.msra.mxu0 %v437_v38 }
 0x1c9   :  { %v801_v29 = vpop.eup %800 }
 0x1ca   :  { %234 = vst.msk [vmem:[#allocation3 + $0x8] sm:$0xff] %vm40_vm0, %v801_v29  ;;  %736 = vmatmul.mubr.msk.f32.gmra.mrb[8].mxu0 %vm40_vm0, %v801_v29 }
 0x1cb   :  { %738 = vmatprep.mubr.msk.f32.mxu0 %vm841_vm1, %v840_v3 }
 0x1cd   :  { %v803_v30 = vpop.eup %802 }
 0x1ce   :  { %739 = vmatmul.mubr.msk.f32.gmra.mrb[10].mxu0 %vm40_vm0, %v803_v30  ;;  %236 = vst.msk [vmem:[#allocation3 + $0x10] sm:$0x3f] %vm235_vm4, %v803_v30 }
 0x1cf   :  { %758 = vmatprep.mubr.msk.f32.mxu0 %vm841_vm1, %v840_v3 }
 0x299   :  { %v314_v31 = vpop.f32.mrb[6].mxu0 }
 0x29a   :  { %v734_v32 = vpop.f32.mrb[7].mxu0 }
 0x29d   :  { %v319_v33 = vpop.f32.mrb[8].mxu0 }
 0x29e   :  { %v786_v34 = vpack.c.bf16 %v319_v33, %v314_v31  ;;  %v737_v35 = vpop.f32.mrb[9].mxu0 }
 0x2a0   :  { %787 = vmatpush3.bf16.msra.mxu1 %v786_v34 }
 0x2a1   :  { %v324_v36 = vpop.f32.mrb[10].mxu0  ;;  %745 = vmatprep.subr.mxu1 %v840_v3 }
 0x2a2   :  { %v740_v37 = vpop.f32.mrb[11].mxu0 }
 0x2a4   :  { %746 = vmatpush3.msk.msra.mxu1 %vm146_vm2, %v324_v36 }
 0x2a5   :  { %748 = vmatmul.mubr.msk.f32.vlgmr.msra.gmra.mrb[6].mxu1 %vm136_vm3, %v927_v14  ;;  %788 = vmatprep.subr.bf16.mxu1 %v842_v6 }
 0x2a6   :  { %750 = vmatprep.mubr.msk.f32.mxu1 %vm841_vm1, %v840_v3 }
 0x2a9   :  { %751 = vmatmul.mubr.msk.f32.gmra.mrb[8].mxu1 %vm136_vm3, %v938_v15 }
 0x2aa   :  { %753 = vmatprep.mubr.msk.f32.mxu1 %vm841_vm1, %v840_v3 }
 0x2ad   :  { %754 = vmatmul.mubr.msk.f32.gmra.mrb[10].mxu1 %vm136_vm3, %v947_v16 }
 0x2ae   :  { %773 = vmatprep.mubr.msk.f32.mxu1 %vm841_vm1, %v840_v3 }
 0x378   :  { %v403_v40 = vpop.f32.mrb[6].mxu1 }
 0x379   :  { %v404_v41 = vadd.f32 %v661_v39, %v403_v40  ;;  %v749_v42 = vpop.f32.mrb[7].mxu1 }
 0x37b   :  { %804 = vtanh.f32 %v404_v41 }
 0x37c   :  { %v408_v43 = vpop.f32.mrb[8].mxu1 }
 0x37d   :  { %v409_v44 = vadd.f32 %v661_v39, %v408_v43  ;;  %v752_v45 = vpop.f32.mrb[9].mxu1 }
 0x37f   :  { %806 = vtanh.f32 %v409_v44 }
 0x380   :  { %v413_v46 = vpop.f32.mrb[10].mxu1 }
 0x381   :  { %v414_v47 = vadd.f32 %v661_v39, %v413_v46  ;;  %v755_v48 = vpop.f32.mrb[11].mxu1 }
 0x383   :  { %808 = vtanh.f32 %v414_v47 }
 0x385   :  { %v805_v49 = vpop.eup %804 }
 0x386   :  { %423 = vrot.lane.b32.xlu0 %v805_v49, %s843_s23  ;;  %759 = vmatmul.mubr.msk.f32.vlgmr.msra.gmra.mrb[12].mxu0 %vm40_vm0, %v805_v49 }
 0x387   :  { %761 = vmatprep.mubr.msk.f32.mxu0 %vm841_vm1, %v840_v3 }
 0x389   :  { %v807_v50 = vpop.eup %806 }
 0x38a   :  { %425 = vrot.lane.b32.xlu0 %v807_v50, %s843_s23  ;;  %762 = vmatmul.mubr.msk.f32.gmra.mrb[14].mxu0 %vm40_vm0, %v807_v50 }
 0x38b   :  { %764 = vmatprep.mubr.msk.f32.mxu0 %vm841_vm1, %v840_v3 }
 0x38d   :  { %v809_v51 = vpop.eup %808 }
 0x38e   :  { %765 = vmatmul.mubr.msk.f32.gmra.mrb[16].mxu0 %vm40_vm0, %v809_v51  ;;  %427 = vrot.lane.b32.xlu1 %v809_v51, %s843_s23 }
 0x3f8   :  { %v424_v52 = vpop.permute.xlu0 %423 }
 0x3f9   :  { %433 = vst.msk [vmem:[#allocation3] sm:$0xff] %vm432_vm5, %v424_v52 }
 0x3fc   :  { %v426_v53 = vpop.permute.xlu0 %425 }
 0x3fd   :  { %434 = vst.msk [vmem:[#allocation3 + $0x8] sm:$0xff] %vm432_vm5, %v426_v53 }
 0x400   :  { %v428_v54 = vpop.permute.xlu1 %427 }
 0x401   :  { %436 = vst.msk [vmem:[#allocation3 + $0x10] sm:$0x3f] %vm435_vm6, %v428_v54 }
 0x459   :  { %v511_v55 = vpop.f32.mrb[12].mxu0 }
 0x45a   :  { %v760_v56 = vpop.f32.mrb[13].mxu0 }
 0x45d   :  { %v516_v57 = vpop.f32.mrb[14].mxu0 }
 0x45e   :  { %v789_v58 = vpack.c.bf16 %v516_v57, %v511_v55  ;;  %v763_v59 = vpop.f32.mrb[15].mxu0 }
 0x460   :  { %790 = vmatpush3.bf16.msra.mxu1 %v789_v58 }
 0x461   :  { %v521_v60 = vpop.f32.mrb[16].mxu0  ;;  %771 = vmatprep.subr.mxu1 %v840_v3 }
 0x462   :  { %v766_v61 = vpop.f32.mrb[17].mxu0 }
 0x464   :  { %772 = vmatpush3.msk.msra.mxu1 %vm146_vm2, %v521_v60 }
 0x465   :  { %774 = vmatmul.mubr.msk.f32.vlgmr.msra.gmra.mrb[12].mxu1 %vm136_vm3, %v927_v14 }
 0x466   :  { %776 = vmatprep.mubr.msk.f32.mxu1 %vm841_vm1, %v840_v3 }
 0x469   :  { %777 = vmatmul.mubr.msk.f32.gmra.mrb[14].mxu1 %vm136_vm3, %v938_v15 }
 0x46a   :  { %779 = vmatprep.mubr.msk.f32.mxu1 %vm841_vm1, %v840_v3 }
 0x46d   :  { %780 = vmatmul.mubr.msk.f32.gmra.mrb[16].mxu1 %vm136_vm3, %v947_v16 }
 0x538   :  { %v600_v63 = vpop.f32.mrb[12].mxu1 }
 0x539   :  { %v601_v0 = vadd.f32 %v669_v62, %v600_v63  ;;  %v775_v1 = vpop.f32.mrb[13].mxu1 }
 0x53b   :  { %810 = vtanh.f32 %v601_v0 }
 0x53c   :  { %v605_v2 = vpop.f32.mrb[14].mxu1 }
 0x53d   :  { %v606_v4 = vadd.f32 %v669_v62, %v605_v2  ;;  %v778_v5 = vpop.f32.mrb[15].mxu1 }
 0x53f   :  { %812 = vtanh.f32 %v606_v4 }
 0x540   :  { %v610_v6 = vpop.f32.mrb[16].mxu1 }
 0x541   :  { %v611_v7 = vadd.f32 %v669_v62, %v610_v6  ;;  %v781_v8 = vpop.f32.mrb[17].mxu1 }
 0x543   :  { %814 = vtanh.f32 %v611_v7 }
 0x545   :  { %v811_v9 = vpop.eup %810 }
 0x546   :  { %620 = vrot.lane.b32.xlu1 %v811_v9, %s844_s5 }
 0x549   :  { %v813_v3 = vpop.eup %812 }
 0x54a   :  { %622 = vrot.lane.b32.xlu0 %v813_v3, %s844_s5 }
 0x54d   :  { %v815_v10 = vpop.eup %814 }
 0x54e   :  { %624 = vrot.lane.b32.xlu1 %v815_v10, %s844_s5 }
 0x5b8   :  { %v621_v11 = vpop.permute.xlu1 %620 }
 0x5b9   :  { %630 = vst.msk [vmem:[#allocation3] sm:$0xff] %vm629_vm7, %v621_v11 }
 0x5bc   :  { %v623_v12 = vpop.permute.xlu0 %622 }
 0x5bd   :  { %631 = vst.msk [vmem:[#allocation3 + $0x8] sm:$0xff] %vm629_vm7, %v623_v12 }
 0x5c0   :  { %v625_v13 = vpop.permute.xlu1 %624 }
 0x5c1   :  { %633 = vst.msk [vmem:[#allocation3 + $0x10] sm:$0x3f] %vm632_vm8, %v625_v13 }
 0x5c2   :  { %827 = shalt.err (!%p824_p4)
}
 0x5c3   :  { %s828_s28 = scalar_lea.hbm %s1035_s8, 384 }
 0x5c4   :  { %p829_p5 = scmp.ne.s32.totalorder %s1035_s8, %s828_s28  ;;  %p832_p6 = scmp.lt.u32.totalorder %s828_s28, %s1035_s8 }
 0x5c6   :  { %p834_p7 = pnand %p832_p6, %p829_p5 }
 0x5c8   :  { %837 = shalt.err (!%p834_p7)
}
 0x5c9   :  { %s846_s2 = smov 128  }
 0x5ca   :  { %645 = dma.vmem_to_hbm [thread:$0]  %s640_s24, 384, %s1035_s8, [#allocation4], %s846_s2, %s846_s2, %s843_s23  }
 0x5cb   :  { %838 = dma.done.wait [#allocation4], 384  }
 0x5cc   :  { %839 = vsyncadd [#allocation4], 4294966912 }
 0x5cd   :  { %649 = vsyncpa [#allocation4], 1 }

</bundles_post_ra>
